<compile_context>
chip_gen: v5e
topology: v5e:2x2
jax: 0.10.0
libtpu: 0.0.40
codegen_flags: <defaults>
</compile_context>

<pallas_src>
import functools

import jax
import jax.numpy as jnp
from jax.experimental import pallas as pl
from jax.experimental.pallas import tpu as pltpu


_LANE = 128
_SUBLANE = 8


def _round_up(x: int, m: int) -> int:
    return ((x + m - 1) // m) * m


def _fm_kernel(x_ref, o_ref, *, num_fields: int, dim: int):
    # x_ref: [TB, N*D] lane-dense block; o_ref: [TB, D].
    tb = x_ref.shape[0]
    acc_sum = jnp.zeros((tb, dim), jnp.float32)
    acc_sq = jnp.zeros((tb, dim), jnp.float32)
    # Static unrolled accumulation over the N feature fields: only two
    # [TB, D] f32 accumulators plus one slice are live at any time.
    for n in range(num_fields):
        xn = x_ref[:, n * dim:(n + 1) * dim].astype(jnp.float32)
        acc_sum = acc_sum + xn
        acc_sq = acc_sq + xn * xn
    o_ref[...] = (0.5 * (acc_sum * acc_sum - acc_sq)).astype(o_ref.dtype)


def factorization_machine(
    inputs: jax.Array,
    *,
    block_b: int | None = None,
    target_payload_bytes: int = 8 * 1024 * 1024,
) -> jax.Array:
    """inputs: [B, N, D] -> [B, D]"""
    B, N, D = inputs.shape
    in_itemsize = jnp.dtype(inputs.dtype).itemsize
    out_dtype = inputs.dtype
    out_itemsize = jnp.dtype(out_dtype).itemsize

    # Free, contiguous row-major reshape -> lane-dense blocks for D < 128.
    x2d = inputs.reshape(B, N * D)

    row_payload_bytes = N * D * in_itemsize
    in_row_padded = _round_up(N * D, _LANE) * in_itemsize
    out_row_padded = _round_up(D, _LANE) * out_itemsize
    acc_row_padded = _round_up(D, _LANE) * 4  # f32 accumulators / slice temp

    headroom = 4 << 20            # compiler scratch headroom
    vmem_cap = 48 << 20           # safe even on v7x (64 MiB physical per TC)
    block_budget = vmem_cap - headroom

    def footprint(tb: int) -> int:
        tbs = _round_up(tb, _SUBLANE)
        blocks = 2 * (tbs * in_row_padded + tbs * out_row_padded)  # double-buffered
        scratch = 3 * tbs * acc_row_padded                          # accs + one slice
        return blocks + scratch

    # Choose the batch tile from the real-payload target (not padded bytes).
    if block_b is None:
        tb = max(1, target_payload_bytes // max(row_payload_bytes, 1))
    else:
        tb = int(block_b)
    tb = min(tb, B)
    if tb < B:
        tb = max(_SUBLANE, (tb // _SUBLANE) * _SUBLANE)

    # Fit the VMEM budget by shrinking TB (never clamp vmem_limit below the
    # real double-buffered footprint).
    while tb > _SUBLANE and footprint(tb) > block_budget:
        tb = max(_SUBLANE, ((tb // 2) // _SUBLANE) * _SUBLANE)

    # v7x megacore: guarantee >= 2 batch tiles whenever the batch is big
    # enough to split on sublane-aligned boundaries, so both TCs get work.
    if block_b is None and B >= 2 * _SUBLANE:
        while tb > _SUBLANE and pl.cdiv(B, tb) < 2:
            tb = max(_SUBLANE, ((tb // 2) // _SUBLANE) * _SUBLANE)

    tb = min(tb, B)

    grid = (pl.cdiv(B, tb),)
    vmem_limit = int(min(max(footprint(tb) + headroom, 8 << 20), vmem_cap))

    cost = pl.CostEstimate(
        flops=3 * B * N * D,
        transcendentals=0,
        bytes_accessed=B * N * D * in_itemsize + B * D * out_itemsize,
    )

    kernel = functools.partial(_fm_kernel, num_fields=N, dim=D)

    return pl.pallas_call(
        kernel,
        out_shape=jax.ShapeDtypeStruct((B, D), out_dtype),
        grid_spec=pltpu.PrefetchScalarGridSpec(
            num_scalar_prefetch=0,
            grid=grid,
            in_specs=[pl.BlockSpec((tb, N * D), lambda b: (b, 0))],
            out_specs=pl.BlockSpec((tb, D), lambda b: (b, 0)),
        ),
        compiler_params=pltpu.CompilerParams(
            dimension_semantics=("parallel",),
            vmem_limit_bytes=vmem_limit,
        ),
        cost_estimate=cost,
    )(x2d)


def _fm_reference(inputs: jax.Array) -> jax.Array:
    x = inputs.astype(jnp.float32)
    square_of_sum = jnp.sum(x, axis=1) ** 2
    sum_of_square = jnp.sum(x ** 2, axis=1)
    return (0.5 * (square_of_sum - sum_of_square)).astype(inputs.dtype)


if __name__ == "__main__":
    key = jax.random.PRNGKey(0)
    k1, k2, k3 = jax.random.split(key, 3)

    # Small shapes consistent with FM: batch=2, feature fields N=8, embed dim D=32.
    B, N, D = 2, 8, 32
    x = jax.random.normal(k1, (B, N, D), dtype=jnp.float32)
    out = jax.block_until_ready(factorization_machine(x))
    ref = _fm_reference(x)
    assert out.shape == (B, D), out.shape
    assert jnp.allclose(out, ref, atol=1e-5, rtol=1e-5), "f32 mismatch vs reference"

    # Multi-block path (including a partial last block): B=40, TB=16.
    B2, N2, D2 = 40, 8, 32
    x2 = jax.random.normal(k2, (B2, N2, D2), dtype=jnp.float32)
    out2 = jax.block_until_ready(factorization_machine(x2, block_b=16))
    ref2 = _fm_reference(x2)
    assert out2.shape == (B2, D2)
    assert jnp.allclose(out2, ref2, atol=1e-5, rtol=1e-5), "tiled f32 mismatch vs reference"

    # bf16 inputs (halves HBM traffic for this mem-bound kernel); f32 accumulation inside.
    x3 = x2.astype(jnp.bfloat16)
    out3 = jax.block_until_ready(factorization_machine(x3, block_b=16))
    ref3 = _fm_reference(x3)
    assert jnp.allclose(out3.astype(jnp.float32), ref3.astype(jnp.float32),
                        atol=5e-2, rtol=5e-2), "bf16 mismatch vs reference"

    # Odd, non-128-aligned trailing dims (N*D=120): exercises the full-extent
    # last-dim block path.
    B4, N4, D4 = 10, 5, 24
    x4 = jax.random.normal(k3, (B4, N4, D4), dtype=jnp.float32)
    out4 = jax.block_until_ready(factorization_machine(x4))
    ref4 = _fm_reference(x4)
    assert out4.shape == (B4, D4)
    assert jnp.allclose(out4, ref4, atol=1e-5, rtol=1e-5), "odd-shape mismatch vs reference"

    print("KERNEL_OK")
</pallas_src>

<mosaic_0001>
module attributes {stable_mosaic.version = 11 : i64} {
  func.func @_fm_kernel(%arg0: i32, %arg1: memref<2x256xf32, #tpu.memory_space<vmem>>, %arg2: memref<2x32xf32, #tpu.memory_space<vmem>>) attributes {dimension_semantics = [#tpu.dimension_semantics<parallel>], iteration_bounds = array<i64: 1>, scalar_prefetch = 0 : i64, scratch_operands = 0 : i64, tpu.core_type = #tpu.core_type<tc>, window_params = [{transform_indices = @transform_0, window_bounds = array<i64: 2, 256>}, {transform_indices = @transform_1, window_bounds = array<i64: 2, 32>}]} {
    %cst = arith.constant 0.000000e+00 : f32
    %0 = vector.broadcast %cst : f32 to vector<2x32xf32>
    %cst_0 = arith.constant 0.000000e+00 : f32
    %1 = vector.broadcast %cst_0 : f32 to vector<2x32xf32>
    %c0 = arith.constant 0 : index
    %c0_1 = arith.constant 0 : index
    %2 = vector.load %arg1[%c0, %c0_1] : memref<2x256xf32, #tpu.memory_space<vmem>>, vector<2x32xf32>
    %3 = arith.addf %0, %2 : vector<2x32xf32>
    %4 = arith.mulf %2, %2 : vector<2x32xf32>
    %5 = arith.addf %1, %4 : vector<2x32xf32>
    %c0_2 = arith.constant 0 : index
    %c32 = arith.constant 32 : index
    %6 = vector.load %arg1[%c0_2, %c32] : memref<2x256xf32, #tpu.memory_space<vmem>>, vector<2x32xf32>
    %7 = arith.addf %3, %6 : vector<2x32xf32>
    %8 = arith.mulf %6, %6 : vector<2x32xf32>
    %9 = arith.addf %5, %8 : vector<2x32xf32>
    %c0_3 = arith.constant 0 : index
    %c64 = arith.constant 64 : index
    %10 = vector.load %arg1[%c0_3, %c64] : memref<2x256xf32, #tpu.memory_space<vmem>>, vector<2x32xf32>
    %11 = arith.addf %7, %10 : vector<2x32xf32>
    %12 = arith.mulf %10, %10 : vector<2x32xf32>
    %13 = arith.addf %9, %12 : vector<2x32xf32>
    %c0_4 = arith.constant 0 : index
    %c96 = arith.constant 96 : index
    %14 = vector.load %arg1[%c0_4, %c96] : memref<2x256xf32, #tpu.memory_space<vmem>>, vector<2x32xf32>
    %15 = arith.addf %11, %14 : vector<2x32xf32>
    %16 = arith.mulf %14, %14 : vector<2x32xf32>
    %17 = arith.addf %13, %16 : vector<2x32xf32>
    %c0_5 = arith.constant 0 : index
    %c128 = arith.constant 128 : index
    %18 = vector.load %arg1[%c0_5, %c128] : memref<2x256xf32, #tpu.memory_space<vmem>>, vector<2x32xf32>
    %19 = arith.addf %15, %18 : vector<2x32xf32>
    %20 = arith.mulf %18, %18 : vector<2x32xf32>
    %21 = arith.addf %17, %20 : vector<2x32xf32>
    %c0_6 = arith.constant 0 : index
    %c160 = arith.constant 160 : index
    %22 = vector.load %arg1[%c0_6, %c160] : memref<2x256xf32, #tpu.memory_space<vmem>>, vector<2x32xf32>
    %23 = arith.addf %19, %22 : vector<2x32xf32>
    %24 = arith.mulf %22, %22 : vector<2x32xf32>
    %25 = arith.addf %21, %24 : vector<2x32xf32>
    %c0_7 = arith.constant 0 : index
    %c192 = arith.constant 192 : index
    %26 = vector.load %arg1[%c0_7, %c192] : memref<2x256xf32, #tpu.memory_space<vmem>>, vector<2x32xf32>
    %27 = arith.addf %23, %26 : vector<2x32xf32>
    %28 = arith.mulf %26, %26 : vector<2x32xf32>
    %29 = arith.addf %25, %28 : vector<2x32xf32>
    %c0_8 = arith.constant 0 : index
    %c224 = arith.constant 224 : index
    %30 = vector.load %arg1[%c0_8, %c224] : memref<2x256xf32, #tpu.memory_space<vmem>>, vector<2x32xf32>
    %31 = arith.addf %27, %30 : vector<2x32xf32>
    %32 = arith.mulf %30, %30 : vector<2x32xf32>
    %33 = arith.addf %29, %32 : vector<2x32xf32>
    %34 = arith.mulf %31, %31 : vector<2x32xf32>
    %35 = arith.subf %34, %33 : vector<2x32xf32>
    %cst_9 = arith.constant 5.000000e-01 : f32
    %36 = vector.broadcast %cst_9 : f32 to vector<2x32xf32>
    %37 = arith.mulf %36, %35 : vector<2x32xf32>
    %c0_10 = arith.constant 0 : index
    %c0_11 = arith.constant 0 : index
    %38 = vector.load %arg2[%c0_10, %c0_11] : memref<2x32xf32, #tpu.memory_space<vmem>>, vector<2x32xf32>
    tpu.vector_store %arg2[%c0_10, %c0_11], %37 {strides = array<i32>} : memref<2x32xf32, #tpu.memory_space<vmem>>, vector<2x32xf32>,
    return
  }
  func.func @transform_0(%arg0: i32) -> (i32, i32) {
    %c0_i32 = arith.constant 0 : i32
    %c0_i32_0 = arith.constant 0 : i32
    return %arg0, %c0_i32 : i32, i32
  }
  func.func @transform_1(%arg0: i32) -> (i32, i32) {
    %c0_i32 = arith.constant 0 : i32
    %c0_i32_0 = arith.constant 0 : i32
    return %arg0, %c0_i32 : i32, i32
  }
}

</mosaic_0001>

<bundles_post_ra>
// kernel: tpu_custom_call.1
= control target key start
LH: loop header
LB: loop body
LE: loop exit
PB: predicated region body
PF: predicated region fallthrough
CT: control target
= control target key end

     0   :  { %6 = vsyncpa [#allocation3], 0  ;;  %s183_s0 = inlined_call_operand.hbm [shape: f32[2,256], index: 0, kind: input, shape index: {}]   ;;  %s184_s1 = inlined_call_operand.hbm [shape: f32[2,32], index: 1, kind: output, shape index: {}]  }
   0x1   :  { %7 = vsyncpa [#allocation4], 0  ;;  %s13_s8 = sshll.u32 %s183_s0, 4  ;;  %s162_s9 = smov [#allocation2]   ;;  %s14_s8 = int_to_ptr.hbm [resolvable:$true] %s13_s8 }
   0x2   :  { %s15_s10 = sshll.u32 %s162_s9, 4  ;;  %s16_s10 = int_to_ptr.vmem [resolvable:$true] %s15_s10 }
   0x3   :  { %18 = dma.hbm_to_vmem [thread:$0]  %s14_s8, 64, %s16_s10, [#allocation3]  }
   0x4   :  { %158 = dma.done.wait [#allocation3], 64  }
   0x5   :  { %159 = vsyncadd [#allocation3], 4294967232  ;;  %v23_v0 = vld [vmem:[#allocation2] sm:$0x3]  ;;  %s163_s11 = smov 64   ;;  %s164_s12 = smov 96  }
   0x6   :  { %37 = vrot.lane.b32.xlu1 %v23_v0, %s163_s11  ;;  %28 = vrot.lane.b32.xlu0 %v23_v0, %s164_s12  ;;  %s165_s13 = smov 32   ;;  %v25_v1 = vmul.f32 %v23_v0, %v23_v0  ;;  %v53_v2 = vld [vmem:[#allocation2 + $0x2] sm:$0x3]  ;;  %s166_s0 = smov [#allocation5]   ;;  %vm86_vm0 = vcmask 254976  }
   0x7   :  { %45 = vrot.lane.b32.xlu2 %v23_v0, %s165_s13  ;;  %v55_v3 = vmul.f32 %v53_v2, %v53_v2  ;;  %s93_s14 = sshll.u32 %s166_s0, 4  ;;  %s95_s17 = sshll.u32 %s184_s1, 4  ;;  %s94_s14 = int_to_ptr.vmem [resolvable:$true] %s93_s14  ;;  %s96_s17 = int_to_ptr.hbm [resolvable:$true] %s95_s17 }
   0xe   :  { %41 = vrot.lane.b32.xlu1 %v25_v1, %s163_s11  ;;  %33 = vrot.lane.b32.xlu0 %v25_v1, %s164_s12 }
   0xf   :  { %49 = vrot.lane.b32.xlu2 %v25_v1, %s165_s13 }
  0x16   :  { %63 = vrot.lane.b32.xlu1 %v55_v3, %s164_s12  ;;  %58 = vrot.lane.b32.xlu0 %v53_v2, %s164_s12 }
  0x17   :  { %67 = vrot.lane.b32.xlu2 %v53_v2, %s163_s11 }
  0x1e   :  { %75 = vrot.lane.b32.xlu1 %v53_v2, %s165_s13  ;;  %71 = vrot.lane.b32.xlu0 %v55_v3, %s163_s11 }
  0x1f   :  { %79 = vrot.lane.b32.xlu2 %v55_v3, %s165_s13 }
  0x61   :  { %v46_v4 = vpop.permute.xlu2 %45 }
  0x69   :  { %v50_v7 = vpop.permute.xlu2 %49 }
  0x71   :  { %v68_v15 = vpop.permute.xlu2 %67 }
  0x78   :  { %v38_v5 = vpop.permute.xlu1 %37  ;;  %v29_v6 = vpop.permute.xlu0 %28 }
  0x79   :  { %v31_v8 = vadd.f32 %v29_v6, %v23_v0  ;;  %v80_v24 = vpop.permute.xlu2 %79 }
  0x7b   :  { %v40_v11 = vadd.f32 %v38_v5, %v31_v8 }
  0x7d   :  { %v48_v14 = vadd.f32 %v46_v4, %v40_v11 }
  0x7f   :  { %v54_v19 = vadd.f32 %v53_v2, %v48_v14 }
  0x80   :  { %v42_v9 = vpop.permute.xlu1 %41  ;;  %v34_v10 = vpop.permute.xlu0 %33 }
  0x81   :  { %v36_v12 = vadd.f32 %v34_v10, %v25_v1 }
  0x83   :  { %v44_v13 = vadd.f32 %v42_v9, %v36_v12 }
  0x85   :  { %v52_v16 = vadd.f32 %v50_v7, %v44_v13 }
  0x87   :  { %v56_v20 = vadd.f32 %v55_v3, %v52_v16 }
  0x88   :  { %v64_v17 = vpop.permute.xlu1 %63  ;;  %v59_v18 = vpop.permute.xlu0 %58 }
  0x89   :  { %v61_v21 = vadd.f32 %v59_v18, %v54_v19  ;;  %v66_v22 = vadd.f32 %v64_v17, %v56_v20 }
  0x8b   :  { %v70_v23 = vadd.f32 %v68_v15, %v61_v21 }
  0x90   :  { %v76_v25 = vpop.permute.xlu1 %75  ;;  %v72_v26 = vpop.permute.xlu0 %71 }
  0x91   :  { %v78_v27 = vadd.f32 %v76_v25, %v70_v23  ;;  %v74_v28 = vadd.f32 %v72_v26, %v66_v22 }
  0x93   :  { %v83_v29 = vmul.f32 %v78_v27, %v78_v27  ;;  %v82_v30 = vadd.f32 %v80_v24, %v74_v28 }
  0x95   :  { %v84_v31 = vsub.f32 %v83_v29, %v82_v30 }
  0x97   :  { %v85_v32 = vmul.f32 0.5, %v84_v31 }
  0x99   :  { %87 = vst.msk [vmem:[#allocation5] sm:$0x3] %vm86_vm0, %v85_v32 }
  0x9a   :  { %98 = dma.vmem_to_hbm [thread:$0]  %s94_s14, 32, %s96_s17, [#allocation4]  }
  0x9b   :  { %160 = dma.done.wait [#allocation4], 32  }
  0x9c   :  { %161 = vsyncadd [#allocation4], 4294967264 }
  0x9d   :  { %103 = vsyncpa [#allocation3], 1 }
  0x9e   :  { %104 = vsyncpa [#allocation4], 1 }

</bundles_post_ra>
